<compile_context>
chip_gen: v5e
topology: v5e:2x2
jax: 0.10.0
libtpu: 0.0.40
codegen_flags: <defaults>
</compile_context>

<pallas_src>
import functools

import jax
import jax.numpy as jnp
import numpy as np
from jax import lax
from jax.experimental import pallas as pl
from jax.experimental.pallas import tpu as pltpu

_NUM_SLICES = 2                       # leading "parallel" grid axis (v7x dual-TC)
_N_TMP = 6                            # assumed live f32 (C, T) temporaries in the body
_X_BYTES_TARGET = 8 * 1024 * 1024     # ~8 MiB of streamed x per block (review item 1)


def _round_up(a, b):
    return ((a + b - 1) // b) * b


def _vmem_budget_and_limit():
    """Generation-aware VMEM working-set budget and scoped limit (review item 2)."""
    try:
        cap = int(pltpu.get_tpu_info().vmem_capacity_bytes)
    except Exception:
        cap = 64 * 1024 * 1024                      # conservative default (v7x per-TC)
    if cap <= 96 * 1024 * 1024:                     # v7x-class: 64 MiB per TensorCore
        return 28 * 1024 * 1024, 44 * 1024 * 1024
    return 72 * 1024 * 1024, 96 * 1024 * 1024       # v5e / v6e: 128 MiB


def _pick_tile(n, c, itemsize, budget, class_on_sublanes, nbuf=2):
    """Largest batch-tile extent whose padded VMEM footprint fits `budget` bytes."""
    per_slice = -(-n // _NUM_SLICES)
    if class_on_sublanes:
        # x tile (C, T): C sublane-padded (16 covers bf16 tiling), T lanes dense.
        # Target tile (1, T) int32 sublane-pads to 8 rows.
        c_sub = _round_up(c, 16)
        per_lane = nbuf * (c_sub * itemsize + 8 * 4) + _N_TMP * _round_up(c, 8) * 4 + 256
        t = budget // per_lane
        t = min(t, _X_BYTES_TARGET // max(1, c * itemsize))
        t = min(t, _round_up(per_slice, 128))
        return max(128, (t // 128) * 128)
    # Row-major path (C >= 128): x tile (T, C) lane-pads C to 128; the (T, 1) int32
    # target column lane-pads to 128 lanes (512 B / row).
    c_lane = _round_up(c, 128)
    per_row = nbuf * (c_lane * itemsize + 512) + _N_TMP * c_lane * 4 + 256
    t = budget // per_row
    t = min(t, _X_BYTES_TARGET // max(1, c * itemsize))
    t = min(t, _round_up(per_slice, 8))
    return max(8, (t // 8) * 8)


def _spec(block_shape, index_map, buffers=None):
    """BlockSpec with optional deeper pipelining (review item 8)."""
    if buffers is not None and hasattr(pl, "Buffered"):
        try:
            return pl.BlockSpec(block_shape, index_map,
                                pipeline_mode=pl.Buffered(buffers))
        except TypeError:
            pass
    return pl.BlockSpec(block_shape, index_map)


def _ldam_kernel(x_ref, m_ref, w_ref, tgt_ref, num_ref, den_ref, *, s, class_axis):
    """One batch tile of the LDAM weighted-CE reduction.

    Layouts (chosen by the wrapper):
      class_axis == 0: x (C, T), m/w (C, 1), tgt (1, T)  [small C: batch on lanes]
      class_axis == 1: x (T, C), m/w (1, C), tgt (T, 1)  [large C: classes on lanes]
    num_ref / den_ref are per-slice (1, 1, 1) partial-sum outputs; their block index
    only depends on the outer ("parallel") grid axis, so they stay resident in VMEM
    across the inner batch axis and are combined / divided in plain JAX afterwards.
    """
    step = pl.program_id(1)

    @pl.when(step == 0)
    def _init():
        num_ref[...] = jnp.zeros_like(num_ref)
        den_ref[...] = jnp.zeros_like(den_ref)

    x = x_ref[...].astype(jnp.float32)      # native dtype in HBM, f32 math in-kernel
    m = m_ref[...]                          # per-class margins (f32)
    w = w_ref[...]                          # per-class CE weights (f32)

    # One-hot of the target with no bool->f32 cast (review item 6).  Padded samples
    # carry target = -1 and match no class -> zero weight -> no contribution.
    cls = lax.broadcasted_iota(jnp.int32, x.shape, class_axis)
    onehot = cls == tgt_ref[...]

    # where(onehot, x - m, x): at the target position m equals m[target], so this
    # reproduces torch.where(index, x - batch_m, x) without any per-row gather.
    z = s * jnp.where(onehot, x - m, x)

    # Weighted softmax cross-entropy ('mean' reduction):
    #   per_sample = logsumexp(z) - z[target];  loss = sum(w_t * per) / sum(w_t)
    zmax = jnp.max(z, axis=class_axis, keepdims=True)
    lse = zmax + jnp.log(jnp.sum(jnp.exp(z - zmax), axis=class_axis, keepdims=True))
    z_t = jnp.sum(jnp.where(onehot, z, 0.0), axis=class_axis, keepdims=True)
    w_t = jnp.sum(jnp.where(onehot, w, 0.0), axis=class_axis, keepdims=True)

    b_axis = 1 - class_axis
    num_ref[...] += jnp.sum(w_t * (lse - z_t), axis=b_axis, keepdims=True)
    den_ref[...] += jnp.sum(w_t, axis=b_axis, keepdims=True)


def ldam_loss(x, target, m_list, weight=None, s=30.0, tile=None):
    """LDAMLoss.forward(x, target) -> scalar loss (float32).

    x: (N, C) logits in their native dtype (bf16 stays bf16 on the wire).
    target: (N,) int labels in [0, C).  Note: out-of-range labels (other than the
    internal -1 padding sentinel) silently become zero-weight rows rather than
    raising, unlike F.cross_entropy.
    """
    x = jnp.asarray(x)
    n, c = x.shape
    if weight is None:
        # Unweighted CE == weighted CE with all-ones weights under 'mean' reduction.
        weight = jnp.ones((c,), jnp.float32)
    m_vec = jnp.asarray(m_list, jnp.float32).reshape(c)
    w_vec = jnp.asarray(weight, jnp.float32).reshape(c)
    tgt = jnp.asarray(target, jnp.int32).reshape(n)

    class_on_sublanes = c < 128
    class_axis = 0 if class_on_sublanes else 1
    budget, vmem_limit = _vmem_budget_and_limit()
    tn = tile or _pick_tile(n, c, x.dtype.itemsize, budget, class_on_sublanes)
    tn = _round_up(tn, 128 if class_on_sublanes else 8)

    n_pad = _round_up(n, _NUM_SLICES * tn)
    steps = n_pad // (_NUM_SLICES * tn)
    if n_pad != n:
        # Padded rows: zero logits + target = -1 -> all-false one-hot -> zero weight.
        x = jnp.pad(x, ((0, n_pad - n), (0, 0)))
        tgt = jnp.pad(tgt, (0, n_pad - n), constant_values=-1)

    x_tile_bytes = tn * c * x.dtype.itemsize
    deep_buffer = steps >= 3 and x_tile_bytes <= 2 * 1024 * 1024    # review item 8

    if class_on_sublanes:
        # Small-C lane-density layout (items 4+5): classes on sublanes, batch on
        # lanes.  One extra XLA transpose pass over x buys 128/128 lane occupancy,
        # zero VMEM lane padding and a lane-dense target stream inside the kernel.
        x = x.T                                          # (C, N_pad)
        tgt = tgt.reshape(1, n_pad)
        m2, w2 = m_vec.reshape(c, 1), w_vec.reshape(c, 1)
        x_block, x_map = (c, tn), (lambda i, j: (0, i * steps + j))
        t_block, t_map = (1, tn), (lambda i, j: (0, i * steps + j))
        cw_block = (c, 1)
    else:
        tgt = tgt.reshape(n_pad, 1)
        m2, w2 = m_vec.reshape(1, c), w_vec.reshape(1, c)
        x_block, x_map = (tn, c), (lambda i, j: (i * steps + j, 0))
        t_block, t_map = (tn, 1), (lambda i, j: (i * steps + j, 0))
        cw_block = (1, c)

    const_map = lambda i, j: (0, 0)
    out_spec = pl.BlockSpec((1, 1, 1), lambda i, j: (i, 0, 0))
    out_sds = jax.ShapeDtypeStruct((_NUM_SLICES, 1, 1), jnp.float32)

    cost = pl.CostEstimate(
        flops=int(12 * n_pad * c),
        transcendentals=int(n_pad * c + n_pad),
        bytes_accessed=int(n_pad * c * x.dtype.itemsize + 4 * n_pad + 8 * c
                           + 8 * _NUM_SLICES),
    )

    kernel = functools.partial(_ldam_kernel, s=float(s), class_axis=class_axis)
    num, den = pl.pallas_call(
        kernel,
        out_shape=(out_sds, out_sds),
        grid=(_NUM_SLICES, steps),
        in_specs=[
            _spec(x_block, x_map, buffers=3 if deep_buffer else None),  # logits stream
            pl.BlockSpec(cw_block, const_map),                          # margins
            pl.BlockSpec(cw_block, const_map),                          # CE weights
            pl.BlockSpec(t_block, t_map),                               # targets stream
        ],
        out_specs=(out_spec, out_spec),
        compiler_params=pltpu.CompilerParams(
            dimension_semantics=("parallel", "arbitrary"),
            vmem_limit_bytes=vmem_limit,
        ),
        cost_estimate=cost,
    )(x, m2, w2, tgt)
    # Final weighted-mean divide in plain JAX over the per-slice partials (item 3).
    return jnp.sum(num) / jnp.sum(den)


def _reference_ldam(x, target, m_list, weight=None, s=30.0):
    """Pure-JAX reference mirroring the PyTorch module (exact index gathers)."""
    x = jnp.asarray(x, jnp.float32)
    n, c = x.shape
    onehot = jax.nn.one_hot(target, c, dtype=jnp.float32)
    batch_m = jnp.asarray(m_list, jnp.float32)[target].reshape(n, 1)
    z = s * jnp.where(onehot.astype(bool), x - batch_m, x)
    logp = jax.nn.log_softmax(z, axis=1)
    per_sample = -jnp.sum(onehot * logp, axis=1)
    if weight is None:
        return jnp.mean(per_sample)
    w_t = jnp.asarray(weight, jnp.float32)[target]
    return jnp.sum(w_t * per_sample) / jnp.sum(w_t)


if __name__ == "__main__":
    # Deterministic setup (mirrors LDAMLoss.__init__): margins from class counts.
    num_classes = 16
    max_m, s = 0.5, 30.0
    cls_num_list = np.array([100, 80, 64, 50, 40, 32, 25, 20,
                             16, 12, 10, 8, 6, 5, 4, 3], dtype=np.float64)
    m_list = 1.0 / np.sqrt(np.sqrt(cls_num_list))
    m_list = jnp.asarray(m_list * (max_m / np.max(m_list)), jnp.float32)

    key = jax.random.PRNGKey(0)
    kx1, kt1, kx2, kt2, kw, kx4, kt4, kw4 = jax.random.split(key, 8)

    # --- case 1: unweighted, f32, small batch (small-C lane-dense path) ----------
    x1 = jax.random.normal(kx1, (8, num_classes), dtype=jnp.float32)
    t1 = jax.random.randint(kt1, (8,), 0, num_classes, dtype=jnp.int32)
    loss1 = ldam_loss(x1, t1, m_list, None, s)
    jax.block_until_ready(loss1)
    ref1 = _reference_ldam(x1, t1, m_list, None, s)
    assert jnp.allclose(loss1, ref1, rtol=1e-5, atol=1e-5), (loss1, ref1)

    # --- case 2: class-weighted, multi-step accumulation + padding + Buffered(3) --
    x2 = jax.random.normal(kx2, (600, num_classes), dtype=jnp.float32)
    t2 = jax.random.randint(kt2, (600,), 0, num_classes, dtype=jnp.int32)
    w2 = jax.random.uniform(kw, (num_classes,), jnp.float32, 0.5, 1.5)
    loss2 = ldam_loss(x2, t2, m_list, w2, s, tile=128)
    jax.block_until_ready(loss2)
    ref2 = _reference_ldam(x2, t2, m_list, w2, s)
    assert jnp.allclose(loss2, ref2, rtol=5e-5, atol=5e-5), (loss2, ref2)

    # --- case 3: bf16 logits stay bf16 in HBM (kernel casts to f32 inside) --------
    x3 = x1.astype(jnp.bfloat16)
    loss3 = ldam_loss(x3, t1, m_list, None, s)
    jax.block_until_ready(loss3)
    ref3 = _reference_ldam(x3.astype(jnp.float32), t1, m_list, None, s)
    assert jnp.allclose(loss3, ref3, rtol=1e-5, atol=1e-5), (loss3, ref3)

    # --- case 4: C >= 128 exercises the row-major (classes-on-lanes) path ---------
    c4 = 256
    cls4 = np.linspace(400.0, 4.0, c4)
    m4 = 1.0 / np.sqrt(np.sqrt(cls4))
    m4 = jnp.asarray(m4 * (max_m / np.max(m4)), jnp.float32)
    x4 = jax.random.normal(kx4, (24, c4), dtype=jnp.float32)
    t4 = jax.random.randint(kt4, (24,), 0, c4, dtype=jnp.int32)
    w4 = jax.random.uniform(kw4, (c4,), jnp.float32, 0.5, 1.5)
    loss4 = ldam_loss(x4, t4, m4, w4, s)
    jax.block_until_ready(loss4)
    ref4 = _reference_ldam(x4, t4, m4, w4, s)
    assert jnp.allclose(loss4, ref4, rtol=1e-5, atol=1e-5), (loss4, ref4)

    print("KERNEL_OK")
</pallas_src>

<mosaic_0001>
module attributes {stable_mosaic.version = 11 : i64} {
  func.func @_ldam_kernel(%arg0: i32, %arg1: i32, %arg2: memref<16x128xf32, #tpu.memory_space<vmem>>, %arg3: memref<16x1xf32, #tpu.memory_space<vmem>>, %arg4: memref<16x1xf32, #tpu.memory_space<vmem>>, %arg5: memref<1x128xi32, #tpu.memory_space<vmem>>, %arg6: memref<1x1x1xf32, #tpu.memory_space<vmem>>, %arg7: memref<1x1x1xf32, #tpu.memory_space<vmem>>) attributes {dimension_semantics = [#tpu.dimension_semantics<parallel>, #tpu.dimension_semantics<arbitrary>], iteration_bounds = array<i64: 2, 1>, scalar_prefetch = 0 : i64, scratch_operands = 0 : i64, tpu.core_type = #tpu.core_type<tc>, window_params = [{transform_indices = @transform_0, window_bounds = array<i64: 16, 128>}, {pipeline_mode = #tpu.pipeline_mode<synchronous>, transform_indices = @transform_1, window_bounds = array<i64: 16, 1>}, {pipeline_mode = #tpu.pipeline_mode<synchronous>, transform_indices = @transform_2, window_bounds = array<i64: 16, 1>}, {transform_indices = @transform_3, window_bounds = array<i64: 1, 128>}, {transform_indices = @transform_4, window_bounds = array<i64: 1, 1, 1>}, {transform_indices = @transform_5, window_bounds = array<i64: 1, 1, 1>}]} {
    %c0_i32 = arith.constant 0 : i32
    %0 = arith.cmpi eq, %arg1, %c0_i32 : i32
    %1 = arith.extui %0 : i1 to i32
    %c0_i32_0 = arith.constant 0 : i32
    %2 = arith.cmpi ne, %1, %c0_i32_0 : i32
    scf.if %2 {
      %cst_28 = arith.constant 0.000000e+00 : f32
      %48 = vector.broadcast %cst_28 : f32 to vector<1x1x1xf32>
      %c0_29 = arith.constant 0 : index
      %c0_30 = arith.constant 0 : index
      %c0_31 = arith.constant 0 : index
      %49 = vector.load %arg6[%c0_29, %c0_30, %c0_31] : memref<1x1x1xf32, #tpu.memory_space<vmem>>, vector<1x1x1xf32>
      tpu.vector_store %arg6[%c0_29, %c0_30, %c0_31], %48 {strides = array<i32>} : memref<1x1x1xf32, #tpu.memory_space<vmem>>, vector<1x1x1xf32>,
      %cst_32 = arith.constant 0.000000e+00 : f32
      %50 = vector.broadcast %cst_32 : f32 to vector<1x1x1xf32>
      %c0_33 = arith.constant 0 : index
      %c0_34 = arith.constant 0 : index
      %c0_35 = arith.constant 0 : index
      %51 = vector.load %arg7[%c0_33, %c0_34, %c0_35] : memref<1x1x1xf32, #tpu.memory_space<vmem>>, vector<1x1x1xf32>
      tpu.vector_store %arg7[%c0_33, %c0_34, %c0_35], %50 {strides = array<i32>} : memref<1x1x1xf32, #tpu.memory_space<vmem>>, vector<1x1x1xf32>,
    } else {
    }
    %c0 = arith.constant 0 : index
    %c0_1 = arith.constant 0 : index
    %3 = vector.load %arg2[%c0, %c0_1] : memref<16x128xf32, #tpu.memory_space<vmem>>, vector<16x128xf32>
    %c0_2 = arith.constant 0 : index
    %c0_3 = arith.constant 0 : index
    %4 = vector.load %arg3[%c0_2, %c0_3] : memref<16x1xf32, #tpu.memory_space<vmem>>, vector<16x1xf32>
    %c0_4 = arith.constant 0 : index
    %c0_5 = arith.constant 0 : index
    %5 = vector.load %arg4[%c0_4, %c0_5] : memref<16x1xf32, #tpu.memory_space<vmem>>, vector<16x1xf32>
    %6 = tpu.iota {dimensions = array<i32: 0>} : vector<16x128xi32>
    %c0_6 = arith.constant 0 : index
    %c0_7 = arith.constant 0 : index
    %7 = vector.load %arg5[%c0_6, %c0_7] : memref<1x128xi32, #tpu.memory_space<vmem>>, vector<1x128xi32>
    %8 = vector.broadcast %7 : vector<1x128xi32> to vector<16x128xi32>
    %9 = arith.cmpi eq, %6, %8 : vector<16x128xi32>
    %10 = vector.broadcast %4 : vector<16x1xf32> to vector<16x128xf32>
    %11 = arith.subf %3, %10 : vector<16x128xf32>
    %12 = arith.select %9, %11, %3 : vector<16x128xi1>, vector<16x128xf32>
    %cst = arith.constant 3.000000e+01 : f32
    %13 = vector.broadcast %cst : f32 to vector<16x128xf32>
    %14 = arith.mulf %13, %12 : vector<16x128xf32>
    %cst_8 = arith.constant dense<0xFF800000> : vector<128xf32>
    %15 = vector.multi_reduction <maximumf>, %14, %cst_8 [0] : vector<16x128xf32> to vector<128xf32>
    %16 = vector.shape_cast %15 : vector<128xf32> to vector<1x128xf32>
    %17 = vector.broadcast %16 : vector<1x128xf32> to vector<16x128xf32>
    %18 = arith.subf %14, %17 : vector<16x128xf32>
    %19 = math.exp %18 : vector<16x128xf32>
    %cst_9 = arith.constant dense<0.000000e+00> : vector<128xf32>
    %20 = vector.multi_reduction <add>, %19, %cst_9 [0] : vector<16x128xf32> to vector<128xf32>
    %21 = vector.shape_cast %20 : vector<128xf32> to vector<1x128xf32>
    %22 = math.log %21 : vector<1x128xf32>
    %23 = arith.addf %16, %22 : vector<1x128xf32>
    %cst_10 = arith.constant 0.000000e+00 : f32
    %24 = vector.broadcast %cst_10 : f32 to vector<16x128xf32>
    %25 = arith.select %9, %14, %24 : vector<16x128xi1>, vector<16x128xf32>
    %cst_11 = arith.constant dense<0.000000e+00> : vector<128xf32>
    %26 = vector.multi_reduction <add>, %25, %cst_11 [0] : vector<16x128xf32> to vector<128xf32>
    %27 = vector.shape_cast %26 : vector<128xf32> to vector<1x128xf32>
    %cst_12 = arith.constant 0.000000e+00 : f32
    %28 = vector.shape_cast %5 : vector<16x1xf32> to vector<16x1xf32>
    %29 = vector.broadcast %28 : vector<16x1xf32> to vector<16x128xf32>
    %30 = vector.broadcast %cst_12 : f32 to vector<16x128xf32>
    %31 = arith.select %9, %29, %30 : vector<16x128xi1>, vector<16x128xf32>
    %cst_13 = arith.constant dense<0.000000e+00> : vector<128xf32>
    %32 = vector.multi_reduction <add>, %31, %cst_13 [0] : vector<16x128xf32> to vector<128xf32>
    %33 = vector.shape_cast %32 : vector<128xf32> to vector<1x128xf32>
    %c0_14 = arith.constant 0 : index
    %c0_15 = arith.constant 0 : index
    %c0_16 = arith.constant 0 : index
    %34 = vector.load %arg6[%c0_14, %c0_15, %c0_16] : memref<1x1x1xf32, #tpu.memory_space<vmem>>, vector<1x1x1xf32>
    %35 = arith.subf %23, %27 : vector<1x128xf32>
    %36 = arith.mulf %33, %35 : vector<1x128xf32>
    %cst_17 = arith.constant dense<0.000000e+00> : vector<1xf32>
    %37 = vector.multi_reduction <add>, %36, %cst_17 [1] : vector<1x128xf32> to vector<1xf32>
    %38 = vector.shape_cast %37 : vector<1xf32> to vector<1x1xf32>
    %39 = vector.shape_cast %38 : vector<1x1xf32> to vector<1x1x1xf32>
    %40 = arith.addf %34, %39 : vector<1x1x1xf32>
    %c0_18 = arith.constant 0 : index
    %c0_19 = arith.constant 0 : index
    %c0_20 = arith.constant 0 : index
    %41 = vector.load %arg6[%c0_18, %c0_19, %c0_20] : memref<1x1x1xf32, #tpu.memory_space<vmem>>, vector<1x1x1xf32>
    tpu.vector_store %arg6[%c0_18, %c0_19, %c0_20], %40 {strides = array<i32>} : memref<1x1x1xf32, #tpu.memory_space<vmem>>, vector<1x1x1xf32>,
    %c0_21 = arith.constant 0 : index
    %c0_22 = arith.constant 0 : index
    %c0_23 = arith.constant 0 : index
    %42 = vector.load %arg7[%c0_21, %c0_22, %c0_23] : memref<1x1x1xf32, #tpu.memory_space<vmem>>, vector<1x1x1xf32>
    %cst_24 = arith.constant dense<0.000000e+00> : vector<1xf32>
    %43 = vector.multi_reduction <add>, %33, %cst_24 [1] : vector<1x128xf32> to vector<1xf32>
    %44 = vector.shape_cast %43 : vector<1xf32> to vector<1x1xf32>
    %45 = vector.shape_cast %44 : vector<1x1xf32> to vector<1x1x1xf32>
    %46 = arith.addf %42, %45 : vector<1x1x1xf32>
    %c0_25 = arith.constant 0 : index
    %c0_26 = arith.constant 0 : index
    %c0_27 = arith.constant 0 : index
    %47 = vector.load %arg7[%c0_25, %c0_26, %c0_27] : memref<1x1x1xf32, #tpu.memory_space<vmem>>, vector<1x1x1xf32>
    tpu.vector_store %arg7[%c0_25, %c0_26, %c0_27], %46 {strides = array<i32>} : memref<1x1x1xf32, #tpu.memory_space<vmem>>, vector<1x1x1xf32>,
    return
  }
  func.func @transform_0(%arg0: i32, %arg1: i32) -> (i32, i32) {
    %c1_i32 = arith.constant 1 : i32
    %0 = arith.muli %arg0, %c1_i32 : i32
    %1 = arith.addi %0, %arg1 : i32
    %c0_i32 = arith.constant 0 : i32
    %c0_i32_0 = arith.constant 0 : i32
    return %c0_i32, %1 : i32, i32
  }
  func.func @transform_1(%arg0: i32, %arg1: i32) -> (i32, i32) {
    %c0_i32 = arith.constant 0 : i32
    %c0_i32_0 = arith.constant 0 : i32
    %c0_i32_1 = arith.constant 0 : i32
    return %c0_i32, %c0_i32_0 : i32, i32
  }
  func.func @transform_2(%arg0: i32, %arg1: i32) -> (i32, i32) {
    %c0_i32 = arith.constant 0 : i32
    %c0_i32_0 = arith.constant 0 : i32
    %c0_i32_1 = arith.constant 0 : i32
    return %c0_i32, %c0_i32_0 : i32, i32
  }
  func.func @transform_3(%arg0: i32, %arg1: i32) -> (i32, i32) {
    %c1_i32 = arith.constant 1 : i32
    %0 = arith.muli %arg0, %c1_i32 : i32
    %1 = arith.addi %0, %arg1 : i32
    %c0_i32 = arith.constant 0 : i32
    %c0_i32_0 = arith.constant 0 : i32
    return %c0_i32, %1 : i32, i32
  }
  func.func @transform_4(%arg0: i32, %arg1: i32) -> (i32, i32, i32) {
    %c0_i32 = arith.constant 0 : i32
    %c0_i32_0 = arith.constant 0 : i32
    %c0_i32_1 = arith.constant 0 : i32
    return %arg0, %c0_i32, %c0_i32_0 : i32, i32, i32
  }
  func.func @transform_5(%arg0: i32, %arg1: i32) -> (i32, i32, i32) {
    %c0_i32 = arith.constant 0 : i32
    %c0_i32_0 = arith.constant 0 : i32
    %c0_i32_1 = arith.constant 0 : i32
    return %arg0, %c0_i32, %c0_i32_0 : i32, i32, i32
  }
}

</mosaic_0001>

<bundles_post_ra>
// kernel: tpu_custom_call.1
= control target key start
LH: loop header
LB: loop body
LE: loop exit
PB: predicated region body
PF: predicated region fallthrough
CT: control target
= control target key end

     0   :  { %s635_s18 = smov 0   ;;  %s637_s19 = smov 0   ;;  %s739_s0 = inlined_call_operand.vmem [shape: f32[16,256], index: 0, kind: input, shape index: {}]   ;;  %s740_s1 = inlined_call_operand.vmem [shape: f32[16,1], index: 1, kind: input, shape index: {}]   ;;  %s741_s2 = inlined_call_operand.vmem [shape: f32[16,1], index: 2, kind: input, shape index: {}]   ;;  %s742_s3 = inlined_call_operand.vmem [shape: s32[1,256], index: 3, kind: input, shape index: {}]   ;;  %s743_s4 = inlined_call_operand.vmem [shape: f32[2,1,1], index: 4, kind: output, shape index: {0}]   ;;  %s744_s5 = inlined_call_operand.vmem [shape: f32[2,1,1], index: 5, kind: output, shape index: {1}]  }
   0x1   :  { %s639_s20 = smov 0   ;;  %s641_s21 = smov 0  }
   0x2   :  { %s643_s22 = smov 0  }
   0x3 LB: > { %s28_s23 = sadd.s32 1, %s597_s21  ;;  %p44_p1 = scmp.ne.s32.totalorder %s589_s19, %s585_s18  ;;  %s601_s22 = sphi %s643_s22, %s16_s22   ;;  %s597_s21 = sphi %s641_s21, %s748_s21   ;;  %s593_s20 = sphi %s639_s20, %s747_s20   ;;  %s589_s19 = sphi %s637_s19, %s746_s19   ;;  %s585_s18 = sphi %s635_s18, %s745_s18  }
   0x4   : > { %p30_p0 = scmp.ge.s32.totalorder %s28_s23, 2  ;;  %p45_p2 = scmp.eq.s32.totalorder %s601_s22, 0 }
   0x5   : > { %s37_s25 = sadd.s32 1, %s589_s19  ;;  %p505_p5 = scmp.ge.s32.totalorder %s601_s22, 2 }
   0x6   : > { %s750_s23 = smov (%p30_p0, %s28_s23), 0  ;;  %p46_p3 = por %p45_p2, %p44_p1 }
   0x7   : > { %s34_s24 = ssub.s32 %s597_s21, %s750_s23  ;;  %198 = sbr.rel (%p505_p5) target bundleno = 18 (0x12), region = 24 }
   0x8   : > { %p35_p4 = scmp.eq.s32.totalorder %s34_s24, 0 }
   0xa   : > { %s670_s26 = scalar_select %p35_p4, %s589_s19, %s37_s25  }
   0xc   : > { %201 = sbr.rel (!%p46_p3) target bundleno = 18 (0x12), region = 28  ;;  %s203_s27 = sand.u32 (%p46_p3), 1, %s589_s19  }
   0xd   : > { %s507_s28 = sshll.u32 (%p46_p3), %s597_s21, 3  ;;  %s506_s29 = sshll.u32 (%p46_p3), %s203_s27, 4 }
   0xe   : > { %s208_s7 = scalar_lea.vmem (%p46_p3), %s739_s0, %s507_s28  ;;  %s205_s8 = scalar_lea.vmem (%p46_p3), [#allocation2], %s506_s29 }
   0xf   : > { %v239_v0 = vld [vmem:[%s208_s7] sm:$0xff] (%p46_p3)  ;;  %v241_v1 = vld [vmem:[%s208_s7 + $0x10] sm:$0xff] (%p46_p3) }
  0x10   : > { %240 = vst [vmem:[%s205_s8] sm:$0xff] (%p46_p3), %v239_v0 }
  0x11   : > { %242 = vst [vmem:[%s205_s8 + $0x8] sm:$0xff] %v241_v1 }
  0x12 PF: > { %p508_p6 = scmp.ge.s32.totalorder %s601_s22, 1  ;;  %p255_p7 = scmp.lt.s32.totalorder %s601_s22, 3 }
  0x14   : > { %p256_p8 = pnand %p508_p6, %p255_p7 }
  0x15   : > { %p296_p9 = scmp.lt.s32.totalorder (!%p256_p8), %s593_s20, 1  ;;  %s262_s27 = sand.u32 (!%p256_p8), 1, %s585_s18  }
  0x16   : > { %259 = sbr.rel (%p256_p8) target bundleno = 339 (0x153), region = 70  ;;  %s509_s28 = sshll.u32 (!%p256_p8), %s262_s27, 4 }
  0x17   : > { %s264_s29 = scalar_lea.vmem (!%p256_p8), [#allocation2], %s509_s28 }
  0x1b   : > { %v315_v2 = vld [vmem:[%s740_s1] sm:$0xff]  ;;  %v603_v4 = vmov 0   ;;  %s752_s20 = smov (!%p296_p9, %s593_s20), 1  ;;  %v316_v5 = vld [vmem:[%s740_s1 + $0x8] sm:$0xff]  ;;  %v319_v7 = vlaneseq  ;;  %vm310_vm2 = vcmask 0   ;;  %v604_v48 = vmov 0.0  }
  0x1c   : > { %v317_v3 = vld [vmem:[%s741_s2] sm:$0xff]  ;;  %554 = vset.pattern.permute.xlu0 %v603_v4  ;;  %555 = vset.pattern.permute.xlu1 %v603_v4  ;;  %s298_s15 = scalar_lea.vmem %s742_s3, %s752_s20  ;;  %v318_v6 = vld [vmem:[%s741_s2 + $0x8] sm:$0xff]  ;;  %s711_s6 = scalar_lea.vmem %s743_s4, %s752_s20 }
  0x1d   : > { %328 = vperm.xlu0 %554, %v315_v2   ;;  %376 = vperm.xlu1 %555, %v317_v3   ;;  %v313_v9 = vld [vmem:[%s264_s29] sm:$0xff]  ;;  %v320_v10 = vshrl.u32 %v319_v7, 7  ;;  %v314_v14 = vld [vmem:[%s264_s29 + $0x8] sm:$0xff]  ;;  %311 = vst.msk [vmem:[%s711_s6] sm:$0x1] %vm310_vm2, %v604_v48  ;;  %s305_s9 = scalar_lea.vmem %s744_s5, %s752_s20 }
  0x1e   : > { %v556_v11 = vld [vmem:[%s298_s15] ss:$0 sm:$0xff]  ;;  %312 = vst.msk [vmem:[%s305_s9] sm:$0x1] %vm310_vm2, %v604_v48 }
  0x1f   : > { %v321_v12 = vadd.s32 8, %v320_v10  ;;  %vm324_vm0 = vcmp.eq.s32.totalorder %v320_v10, %v556_v11 }
  0x21   : > { %vm325_vm1 = vcmp.eq.s32.totalorder %v321_v12, %v556_v11 }
  0x24   : > { %v393_v3 = vld [vmem:[%s711_s6] sm:$0x1] }
  0x25   : > { %333 = vperm.xlu0 %554, %v316_v5   ;;  %381 = vperm.xlu1 %555, %v318_v6   ;;  %v401_v6 = vld [vmem:[%s305_s9] sm:$0x1] }
  0x8f   : > { %v329_v8 = vpop.permute.xlu0 %328  ;;  %v377_v27 = vpop.permute.xlu1 %376 }
  0x90   : > { %v336_v13 = vsub.f32 %v313_v9, %v329_v8  ;;  %v384_v37 = vsel %vm324_vm0, %v377_v27, 0.0 }
  0x92   : > { %v338_v17 = vsel %vm324_vm0, %v336_v13, %v313_v9 }
  0x93   : > { %v340_v19 = vmul.f32 30.0, %v338_v17 }
  0x95   : > { %v365_v36 = vsel %vm324_vm0, %v340_v19, 0.0 }
  0x97   : > { %v334_v15 = vpop.permute.xlu0 %333  ;;  %v382_v33 = vpop.permute.xlu1 %381 }
  0x98   : > { %v337_v16 = vsub.f32 %v314_v14, %v334_v15  ;;  %v385_v38 = vsel %vm325_vm1, %v382_v33, 0.0 }
  0x99   : > { %v386_v42 = vadd.f32 %v385_v38, %v384_v37 }
  0x9a   : > { %v339_v18 = vsel %vm325_vm1, %v337_v16, %v314_v14 }
  0x9b   : > { %v341_v20 = vmul.f32 30.0, %v339_v18  ;;  %v387_v46 = vrot.slane %v386_v42, 4 }
  0x9d   : > { %v342_v21 = vmax.f32 %v340_v19, %v341_v20  ;;  %v366_v34 = vsel %vm325_vm1, %v341_v20, 0.0  ;;  %v388_v51 = vadd.f32 %v387_v46, %v386_v42 }
  0x9e   : > { %v367_v40 = vadd.f32 %v366_v34, %v365_v36 }
  0x9f   : > { %v343_v22 = vrot.slane %v342_v21, 4  ;;  %v389_v55 = vrot.slane %v388_v51, 2 }
  0xa0   : > { %v368_v44 = vrot.slane %v367_v40, 4 }
  0xa1   : > { %v344_v23 = vmax.f32 %v342_v21, %v343_v22  ;;  %v390_v57 = vadd.f32 %v389_v55, %v388_v51 }
  0xa2   : > { %v369_v49 = vadd.f32 %v368_v44, %v367_v40 }
  0xa3   : > { %v345_v24 = vrot.slane %v344_v23, 2  ;;  %v391_v61 = vrot.slane %v390_v57, 1 }
  0xa4   : > { %v370_v53 = vrot.slane %v369_v49, 2 }
  0xa5   : > { %v346_v25 = vmax.f32 %v344_v23, %v345_v24  ;;  %v392_v0 = vadd.f32 %v391_v61, %v390_v57 }
  0xa6   : > { %v371_v56 = vadd.f32 %v370_v53, %v369_v49 }
  0xa7   : > { %v347_v26 = vrot.slane %v346_v25, 1 }
  0xa8   : > { %v372_v58 = vrot.slane %v371_v56, 1 }
  0xa9   : > { %v348_v28 = vmax.f32 %v346_v25, %v347_v26 }
  0xaa   : > { %v373_v63 = vadd.f32 %v372_v58, %v371_v56 }
  0xab   : > { %v349_v29 = vsub.f32 %v340_v19, %v348_v28  ;;  %v350_v30 = vsub.f32 %v341_v20, %v348_v28 }
  0xad   : > { %v351_v31 = vmul.f32 1.442695, %v349_v29  ;;  %v353_v32 = vmul.f32 1.442695, %v350_v30 }
  0xaf   : > { %557 = vpow2.f32 %v351_v31 }
  0xb0   : > { %559 = vpow2.f32 %v353_v32 }
  0xb5   : > { %v558_v35 = vpop.eup %557 }
  0xb6   : > { %v560_v39 = vpop.eup %559 }
  0xb7   : > { %v355_v41 = vadd.f32 %v560_v39, %v558_v35 }
  0xb9   : > { %v356_v43 = vrot.slane %v355_v41, 4 }
  0xbb   : > { %v357_v45 = vadd.f32 %v356_v43, %v355_v41 }
  0xbd   : > { %v358_v47 = vrot.slane %v357_v45, 2 }
  0xbf   : > { %v359_v50 = vadd.f32 %v358_v47, %v357_v45 }
  0xc1   : > { %v360_v52 = vrot.slane %v359_v50, 1 }
  0xc3   : > { %v361_v54 = vadd.f32 %v360_v52, %v359_v50 }
  0xc5   : > { %561 = vlog2.f32 %v361_v54 }
  0xcb   : > { %v562_v59 = vpop.eup %561 }
  0xcc   : > { %v363_v60 = vmul.f32 0.6931472, %v562_v59 }
  0xce   : > { %v364_v62 = vadd.f32 %v363_v60, %v348_v28 }
  0xd0   : > { %v394_v1 = vsub.f32 %v364_v62, %v373_v63 }
  0xd2   : > { %v395_v2 = vmul.f32 %v394_v1, %v392_v0 }
  0xd4   : > { %396 = vadd.xlane.f32.xlu2 %v395_v2 }
  0xdc   : > { %402 = vadd.xlane.f32.xlu2 %v392_v0 }
 0x147   : > { %v397_v4 = vpop.xlane.xlu2 %396 }
 0x148   : > { %v398_v5 = vadd.f32 %v397_v4, %v393_v3 }
 0x14a   : > { %400 = vst.msk [vmem:[%s711_s6] sm:$0x1] %vm310_vm2, %v398_v5 }
 0x14f   : > { %v403_v7 = vpop.xlane.xlu2 %402 }
 0x150   : > { %v404_v8 = vadd.f32 %v403_v7, %v401_v6 }
 0x152   : > { %405 = vst.msk [vmem:[%s305_s9] sm:$0x1] %vm310_vm2, %v404_v8 }
 0x153 PF: > { %s16_s22 = sadd.s32 1, %s601_s22   ;;  %s745_s18 = smov %s589_s19 }
 0x154   : > { %p13_p10 = scmp.ge.s32.totalorder %s16_s22, 4   ;;  %s746_s19 = smov %s670_s26 }
 0x155   : > { %s747_s20 = smov %s597_s21  ;;  %s748_s21 = smov %s750_s23 }
 0x156   :  { %15 = sbr.rel (!%p13_p10) target bundleno = 3 (0x3), region = 128 }

</bundles_post_ra>
